<compile_context>
chip_gen: v7x
topology: tpu7x:2x2x1
jax: 0.10.0
libtpu: 0.0.40
codegen_flags: <defaults>
</compile_context>

<pallas_src>
import jax
import jax.numpy as jnp
import numpy as np
from jax.experimental import pallas as pl
from jax.experimental.pallas import tpu as pltpu


# ----------------------------- kernels ------------------------------------ #

def _dense_kernel(xp_ref, w_ref, pos_ref, o_ref):
    # xp_ref : (TB, TN, K)   patches (compute dtype)
    # w_ref  : (K, E)        block-diagonal grouped-conv weight (groups pre-merged)
    # pos_ref: (TN, E)       f32 positional embedding with the conv bias folded in
    # o_ref  : (TB, TN, E)
    tb, tn, k = xp_ref.shape
    e = o_ref.shape[-1]
    xp = xp_ref[...].reshape(tb * tn, k)            # merge (b, n) into the MXU M dim
    acc = jnp.dot(xp, w_ref[...], preferred_element_type=jnp.float32)
    o_ref[...] = (acc.reshape(tb, tn, e) + pos_ref[...]).astype(o_ref.dtype)


def _grouped_kernel(xp_ref, w_ref, pos_ref, o_ref):
    # xp_ref : (TB, G, TN, Kg)  patches in grouped layout
    # w_ref  : (G, Kg, Eg)      compact grouped weight (no zero blocks)
    # pos_ref: (TN, E)          f32 positional embedding with the conv bias folded in
    # o_ref  : (TB, TN, E)
    tb, g, tn, kg = xp_ref.shape
    e = o_ref.shape[-1]
    eg = e // g
    xp = xp_ref[...]
    w = w_ref[...]
    pos = pos_ref[...]
    for gi in range(g):                              # static, small (groups == 4)
        xg = xp[:, gi].reshape(tb * tn, kg)
        acc = jnp.dot(xg, w[gi], preferred_element_type=jnp.float32)
        acc = acc.reshape(tb, tn, eg) + pos[:, gi * eg:(gi + 1) * eg]
        # Eg % 128 == 0 -> lane-aligned unmasked slice store; no concatenate.
        o_ref[:, :, gi * eg:(gi + 1) * eg] = acc.astype(o_ref.dtype)


# ------------------------- sizing / hardware query ------------------------- #

def _round_up(x, m):
    return (x + m - 1) // m * m


def _tile_vmem_bytes(shape, dtype):
    """VMEM bytes of one block after (sublane, 128)-lane tile padding."""
    itemsize = np.dtype(dtype).itemsize
    if len(shape) < 2:
        return _round_up(int(shape[0]) * itemsize, 512) if shape else 512
    sub = 8 * max(1, 4 // itemsize)                  # 8 rows f32, 16 rows bf16, ...
    lead = 1
    for d in shape[:-2]:
        lead *= int(d)
    return lead * _round_up(int(shape[-2]), sub) * _round_up(int(shape[-1]), 128) * itemsize


def _tpu_budget():
    """(vmem capacity, usable VMEM budget, TensorCores fed by one kernel)."""
    vmem = 64 * 1024 * 1024            # conservative default (v7x per-core VMEM)
    cores = 1
    try:
        info = pltpu.get_tpu_info()
        vmem = int(getattr(info, "vmem_capacity_bytes", vmem))
        for name in ("num_tensorcores", "tensorcore_count", "num_cores", "core_count"):
            v = getattr(info, name, None)
            if isinstance(v, int) and v > 0:
                cores = v
                break
    except Exception:
        pass
    if cores == 1:
        try:
            kind = jax.devices()[0].device_kind.lower()
            if any(t in kind for t in ("v4", "v5p", "v7", "7x")):
                cores = 2              # megacore / dual-TC chips
        except Exception:
            pass
    # Leave headroom for Mosaic internal scratch; ~48 MiB on v7x, ~96 MiB on v5e/v6e.
    budget = min(int(vmem * 3 // 4), 100 * 1024 * 1024)
    return vmem, budget, cores


def _working_set(TB, TN, prm, nbuf_in=2, nbuf_out=2):
    """Honest per-step VMEM footprint: multi-buffered x/out blocks, weight and
    pos blocks (also double-buffered by the pipeline), plus in-kernel f32 temps."""
    if prm["grouped"]:
        xb = _tile_vmem_bytes((TB, prm["G"], TN, prm["Kg"]), prm["x_dtype"])
        wb = _tile_vmem_bytes((prm["G"], prm["Kg"], prm["Eg"]), prm["w_dtype"])
    else:
        xb = _tile_vmem_bytes((TB, TN, prm["K"]), prm["x_dtype"])
        wb = _tile_vmem_bytes((prm["K"], prm["E"]), prm["w_dtype"])
    ob = _tile_vmem_bytes((TB, TN, prm["E"]), prm["o_dtype"])
    pb = _tile_vmem_bytes((TN, prm["E"]), jnp.float32)
    tmp = 2 * _tile_vmem_bytes((TB, TN, prm["E"]), jnp.float32)
    return nbuf_in * xb + nbuf_out * ob + 2 * (wb + pb) + tmp, ob


def _divisors_desc(n):
    return [d for d in range(n, 0, -1) if n % d == 0]


def _pick_tiles(B, NN, prm, budget, cores, out_block_cap=8 * 1024 * 1024):
    # Sequence tiles must keep the (8, 128) rule: TN == NN or TN % 8 == 0.
    tn_opts = [NN] + [d for d in _divisors_desc(NN) if d != NN and d % 8 == 0]
    TB, TN = 1, tn_opts[-1]
    found = False
    for tn in tn_opts:                 # biggest tiles first: long DMAs, few grid
        for tb in _divisors_desc(B):   # steps, large merged MXU M dim (TB*TN).
            ws, ob = _working_set(tb, tn, prm)
            if ws <= budget and ob <= out_block_cap:
                TB, TN, found = tb, tn, True
                break
        if found:
            break
    # Split the sequence axis only when the chip has >1 TensorCore and the grid
    # is otherwise too small to feed them (v5e/v6e have 1 TC: keep TN = NN).
    if cores > 1 and (B // TB) * (NN // TN) < cores:
        for d in [d for d in _divisors_desc(NN) if d < TN and d % 8 == 0]:
            if (B // TB) * (NN // d) >= cores:
                TN = d
                break
        else:
            for d in [d for d in _divisors_desc(B) if d < TB]:
                if (B // d) * (NN // TN) >= cores:
                    TB = d
                    break
    return TB, TN


# ----------------------------- wrapper ------------------------------------ #

def image2seq(x, conv_w, conv_b, pos_emb, *, N, groups=4, batch_first=True,
              compute_dtype=jnp.bfloat16, out_dtype=None):
    """Forward pass of Image2Seq with a Pallas TPU kernel.

    x:        (B, C, H, W)  NCHW input (PyTorch convention)
    conv_w:   (E, C//groups, p, p)  grouped-conv weight (PyTorch layout)
    conv_b:   (E,)
    pos_emb:  (1, N*N, E)
    compute_dtype: bf16 (fast, ~1e-2 rel error) or float32 (exact-parity option).
    out_dtype:     output dtype (defaults to x.dtype); bf16 halves the dominant
                   HBM write stream of this bandwidth-bound op.
    returns:  (B, N*N, E) if batch_first else (N*N, B, E)
    """
    B, C, H, W = x.shape
    E = conv_w.shape[0]
    p = H // N
    assert p * N == H and H == W, "img_size must be divisible by N"
    assert C % groups == 0 and E % groups == 0
    Cg, Eg = C // groups, E // groups
    Kg, K = Cg * p * p, C * p * p
    NN = N * N
    out_dtype = x.dtype if out_dtype is None else out_dtype

    # Fold the conv bias into the positional embedding (kept f32).
    posb = (pos_emb.reshape(NN, E).astype(jnp.float32)
            + conv_b.reshape(1, E).astype(jnp.float32))

    # Cast BEFORE the relayout so the XLA transpose pass writes compute_dtype.
    # TODO(synk): fuse this NCHW->patch gather into the kernel once a robust
    # lane<->sublane relayout is available in Mosaic.
    xc = x.astype(compute_dtype)

    # Grouped path only when the per-group contraction is MXU-sized and the
    # per-group output is lane-aligned; otherwise pre-merge groups into one
    # dense block-diagonal matmul (single MXU op instead of G tiny ones).
    use_grouped = (Eg % 128 == 0) and (Kg >= 128)

    _, budget, cores = _tpu_budget()
    params = dict(grouped=use_grouped, G=groups, Kg=Kg, Eg=Eg, K=K, E=E,
                  x_dtype=compute_dtype, w_dtype=compute_dtype, o_dtype=out_dtype)
    TB, TN = _pick_tiles(B, NN, params, budget, cores)

    # Batch innermost: weight / pos block indices are constant along the inner
    # loop, so the pipeline elides their re-fetch.
    grid = (NN // TN, B // TB)
    steps = grid[0] * grid[1]
    ws3, _ = _working_set(TB, TN, params, nbuf_in=3, nbuf_out=3)
    deep = steps >= 8 and ws3 <= budget          # deeper pipelining for long grids

    def _spec(shape, index_map):
        if deep:
            return pl.BlockSpec(shape, index_map, pipeline_mode=pl.Buffered(3))
        return pl.BlockSpec(shape, index_map)

    if use_grouped:
        # (B, G, NN, Kg): group-major channel split; matches PyTorch grouped
        # Conv2d where input channels [g*Cg, (g+1)*Cg) feed output group g.
        xp = (xc.reshape(B, groups, Cg, N, p, N, p)
                .transpose(0, 1, 3, 5, 2, 4, 6)
                .reshape(B, groups, NN, Kg))
        w_op = jnp.transpose(conv_w.reshape(groups, Eg, Kg), (0, 2, 1)).astype(compute_dtype)
        kernel = _grouped_kernel
        x_spec = _spec((TB, groups, TN, Kg), lambda n, b: (b, 0, n, 0))
        w_spec = pl.BlockSpec((groups, Kg, Eg), lambda n, b: (0, 0, 0))
    else:
        # (B, NN, K) with channel-major patch flatten (c, ph, pw).  NOTE: the
        # block-diagonal weight below assumes this group-contiguous channel
        # ordering (PyTorch grouped Conv2d layout).
        xp = (xc.reshape(B, C, N, p, N, p)
                .transpose(0, 2, 4, 1, 3, 5)
                .reshape(B, NN, K))
        w_g = conv_w.reshape(groups, Eg, Kg)
        blocks = []
        for g in range(groups):
            cols = [jnp.transpose(w_g[g]) if gi == g
                    else jnp.zeros((Kg, Eg), conv_w.dtype) for gi in range(groups)]
            blocks.append(jnp.concatenate(cols, axis=1))
        w_op = jnp.concatenate(blocks, axis=0).astype(compute_dtype)      # (K, E)
        kernel = _dense_kernel
        x_spec = _spec((TB, TN, K), lambda n, b: (b, n, 0))
        w_spec = pl.BlockSpec((K, E), lambda n, b: (0, 0))

    out = pl.pallas_call(
        kernel,
        out_shape=jax.ShapeDtypeStruct((B, NN, E), out_dtype),
        grid=grid,
        in_specs=[x_spec,
                  w_spec,
                  pl.BlockSpec((TN, E), lambda n, b: (n, 0))],
        out_specs=_spec((TB, TN, E), lambda n, b: (b, n, 0)),
        compiler_params=pltpu.CompilerParams(
            dimension_semantics=("parallel", "parallel"),
            vmem_limit_bytes=int(budget),
        ),
    )(xp, w_op, posb)

    if not batch_first:
        out = jnp.transpose(out, (1, 0, 2))
    return out


# ----------------------------- reference ---------------------------------- #

def image2seq_reference(x, conv_w, conv_b, pos_emb, *, N, groups=4, batch_first=True):
    """Pure-JAX reference (mirrors PyTorch grouped Conv2d semantics)."""
    p = x.shape[2] // N
    y = jax.lax.conv_general_dilated(
        x, conv_w, window_strides=(p, p), padding="VALID",
        dimension_numbers=("NCHW", "OIHW", "NCHW"),
        feature_group_count=groups)
    y = y + conv_b.reshape(1, -1, 1, 1)
    B, E, Nh, Nw = y.shape
    y = y.reshape(B, E, Nh * Nw).transpose(0, 2, 1)      # flatten(2).transpose(1,2)
    y = y + pos_emb
    if not batch_first:
        y = jnp.transpose(y, (1, 0, 2))
    return y


# ----------------------------- test --------------------------------------- #

if __name__ == "__main__":
    fwd = jax.jit(image2seq,
                  static_argnames=("N", "groups", "batch_first",
                                   "compute_dtype", "out_dtype"))

    configs = [
        # dense path, f32 compute (exact-parity option), tiny E
        dict(img_size=16, N=8, channels=4, emb_size=32, batch=2,
             compute_dtype=jnp.float32, out_dtype=None,
             batch_first=True, rtol=1e-2, atol=1e-2),
        # dense path (Kg=4 too small for the MXU -> groups pre-merged), bf16 compute
        dict(img_size=16, N=8, channels=4, emb_size=512, batch=2,
             compute_dtype=jnp.bfloat16, out_dtype=None,
             batch_first=True, rtol=2e-2, atol=2e-2),
        # grouped path (Kg=256, Eg=128): compact weights, per-group lane-aligned stores
        dict(img_size=32, N=2, channels=4, emb_size=512, batch=2,
             compute_dtype=jnp.bfloat16, out_dtype=None,
             batch_first=True, rtol=3e-2, atol=6e-2),
        # bf16 output (halves the dominant HBM write stream), batch_first=False
        dict(img_size=16, N=8, channels=4, emb_size=512, batch=2,
             compute_dtype=jnp.bfloat16, out_dtype=jnp.bfloat16,
             batch_first=False, rtol=3e-2, atol=3e-2),
    ]

    for cfg in configs:
        img_size, N = cfg["img_size"], cfg["N"]
        channels, emb_size, batch = cfg["channels"], cfg["emb_size"], cfg["batch"]
        patch_size = img_size // N
        batch_first = cfg["batch_first"]

        key = jax.random.PRNGKey(0)
        k_x, k_w, k_b, k_pos = jax.random.split(key, 4)
        x = jax.random.normal(k_x, (batch, channels, img_size, img_size), jnp.float32)
        conv_w = 0.1 * jax.random.normal(
            k_w, (emb_size, channels // 4, patch_size, patch_size), jnp.float32)
        conv_b = 0.1 * jax.random.normal(k_b, (emb_size,), jnp.float32)
        pos_emb = jax.random.normal(k_pos, (1, N * N, emb_size), jnp.float32)

        out = fwd(x, conv_w, conv_b, pos_emb, N=N, groups=4,
                  batch_first=batch_first,
                  compute_dtype=cfg["compute_dtype"], out_dtype=cfg["out_dtype"])
        out = jax.block_until_ready(out)

        ref = image2seq_reference(x, conv_w, conv_b, pos_emb, N=N, groups=4,
                                  batch_first=batch_first)
        expected_shape = ((batch, N * N, emb_size) if batch_first
                          else (N * N, batch, emb_size))
        assert out.shape == expected_shape, (out.shape, expected_shape)
        np.testing.assert_allclose(np.asarray(out, dtype=np.float32),
                                   np.asarray(ref, dtype=np.float32),
                                   rtol=cfg["rtol"], atol=cfg["atol"])

    print("KERNEL_OK")
</pallas_src>

<mosaic_0001>
module attributes {stable_mosaic.version = 11 : i64} {
  func.func @_dense_kernel(%arg0: i32, %arg1: i32, %arg2: memref<2x64x16xf32, #tpu.memory_space<vmem>>, %arg3: memref<16x32xf32, #tpu.memory_space<vmem>>, %arg4: memref<64x32xf32, #tpu.memory_space<vmem>>, %arg5: memref<2x64x32xf32, #tpu.memory_space<vmem>>) attributes {dimension_semantics = [#tpu.dimension_semantics<parallel>, #tpu.dimension_semantics<parallel>], iteration_bounds = array<i64: 1, 1>, scalar_prefetch = 0 : i64, scratch_operands = 0 : i64, tpu.core_type = #tpu.core_type<tc>, window_params = [{transform_indices = @transform_0, window_bounds = array<i64: 2, 64, 16>}, {pipeline_mode = #tpu.pipeline_mode<synchronous>, transform_indices = @transform_1, window_bounds = array<i64: 16, 32>}, {transform_indices = @transform_2, window_bounds = array<i64: 64, 32>}, {transform_indices = @transform_3, window_bounds = array<i64: 2, 64, 32>}]} {
    %c0 = arith.constant 0 : index
    %c0_0 = arith.constant 0 : index
    %c0_1 = arith.constant 0 : index
    %0 = vector.load %arg2[%c0, %c0_0, %c0_1] : memref<2x64x16xf32, #tpu.memory_space<vmem>>, vector<2x64x16xf32>
    %1 = vector.shape_cast %0 : vector<2x64x16xf32> to vector<128x16xf32>
    %c0_2 = arith.constant 0 : index
    %c0_3 = arith.constant 0 : index
    %2 = vector.load %arg3[%c0_2, %c0_3] : memref<16x32xf32, #tpu.memory_space<vmem>>, vector<16x32xf32>
    %cst = arith.constant dense<0.000000e+00> : vector<128x32xf32>
    %3 = tpu.matmul %1, %2, %cst {dimension_numbers = #tpu.dot_dimension_numbers<[1], [0], [0], [1], [0, 0, 1, 1], [], []>} : vector<128x16xf32>, vector<16x32xf32>, vector<128x32xf32> -> vector<128x32xf32>
    %4 = vector.shape_cast %3 : vector<128x32xf32> to vector<2x64x32xf32>
    %c0_4 = arith.constant 0 : index
    %c0_5 = arith.constant 0 : index
    %5 = vector.load %arg4[%c0_4, %c0_5] : memref<64x32xf32, #tpu.memory_space<vmem>>, vector<64x32xf32>
    %6 = vector.shape_cast %5 : vector<64x32xf32> to vector<1x64x32xf32>
    %7 = vector.broadcast %6 : vector<1x64x32xf32> to vector<2x64x32xf32>
    %8 = arith.addf %4, %7 : vector<2x64x32xf32>
    %c0_6 = arith.constant 0 : index
    %c0_7 = arith.constant 0 : index
    %c0_8 = arith.constant 0 : index
    %9 = vector.load %arg5[%c0_6, %c0_7, %c0_8] : memref<2x64x32xf32, #tpu.memory_space<vmem>>, vector<2x64x32xf32>
    tpu.vector_store %arg5[%c0_6, %c0_7, %c0_8], %8 {strides = array<i32>} : memref<2x64x32xf32, #tpu.memory_space<vmem>>, vector<2x64x32xf32>,
    return
  }
  func.func @transform_0(%arg0: i32, %arg1: i32) -> (i32, i32, i32) {
    %c0_i32 = arith.constant 0 : i32
    %c0_i32_0 = arith.constant 0 : i32
    return %arg1, %arg0, %c0_i32 : i32, i32, i32
  }
  func.func @transform_1(%arg0: i32, %arg1: i32) -> (i32, i32) {
    %c0_i32 = arith.constant 0 : i32
    %c0_i32_0 = arith.constant 0 : i32
    %c0_i32_1 = arith.constant 0 : i32
    return %c0_i32, %c0_i32_0 : i32, i32
  }
  func.func @transform_2(%arg0: i32, %arg1: i32) -> (i32, i32) {
    %c0_i32 = arith.constant 0 : i32
    %c0_i32_0 = arith.constant 0 : i32
    return %arg0, %c0_i32 : i32, i32
  }
  func.func @transform_3(%arg0: i32, %arg1: i32) -> (i32, i32, i32) {
    %c0_i32 = arith.constant 0 : i32
    %c0_i32_0 = arith.constant 0 : i32
    return %arg1, %arg0, %c0_i32 : i32, i32, i32
  }
}

</mosaic_0001>

<bundles_post_ra>
// kernel: image2seq.1
= control target key start
LH: loop header
LB: loop body
LE: loop exit
PB: predicated region body
PF: predicated region fallthrough
CT: control target
= control target key end

     0   :  { %vm32_vm0 = vcmask 130048   ;;  %vm250_vm1 = vcmask 261120   ;;  %s517_s1 = inlined_call_operand.vmem [shape: f32[16,32], index: 1, kind: input, shape index: {}]   ;;  %s518_s0 = inlined_call_operand.vmem [shape: f32[2,64,16], index: 0, kind: input, shape index: {}]   ;;  %s519_s2 = inlined_call_operand.vmem [shape: f32[64,32], index: 2, kind: input, shape index: {}]   ;;  %s520_s3 = inlined_call_operand.vmem [shape: f32[2,64,32], index: 3, kind: output, shape index: {}]  }
   0x1   :  { %v30_v0 = vld [vmem:[%s517_s1] sm:$0xff]  ;;  %v31_v1 = vld [vmem:[%s517_s1 + $0x8] sm:$0xff]  ;;  %v16_v7 = vld [vmem:[%s518_s0 + $0x10] sm:$0xff] }
   0x2   :  { %v14_v2 = vld [vmem:[%s518_s0] sm:$0xff]  ;;  %v333_v3 = vpack.c.bf16 %v31_v1, %v30_v0  ;;  %v15_v5 = vld [vmem:[%s518_s0 + $0x8] sm:$0xff]  ;;  %v24_v8 = vld [vmem:[%s518_s0 + $0x50] sm:$0xff] }
   0x3   :  { %309 = vmatprep.mubr.msk.f32.mxu0 %vm32_vm0, %v14_v2  ;;  %v22_v4 = vld [vmem:[%s518_s0 + $0x40] sm:$0xff]  ;;  %v23_v6 = vld [vmem:[%s518_s0 + $0x48] sm:$0xff]  ;;  %v17_v9 = vld [vmem:[%s518_s0 + $0x18] sm:$0xff] }
   0x4   :  { %321 = vmatprep.mubr.msk.f32.mxu1 %vm32_vm0, %v22_v4  ;;  %334 = vmatprep.subr.bf16.mxu0 %v333_v3  ;;  %v25_v10 = vld [vmem:[%s518_s0 + $0x58] sm:$0xff]  ;;  %v18_v11 = vld [vmem:[%s518_s0 + $0x20] sm:$0xff]  ;;  %v19_v13 = vld [vmem:[%s518_s0 + $0x28] sm:$0xff] }
   0x5   :  { %337 = vmatprep.subr.bf16.mxu1 %v333_v3  ;;  %336 = vmatpush3.bf16.msra.mxu0 %v333_v3  ;;  %v26_v12 = vld [vmem:[%s518_s0 + $0x60] sm:$0xff]  ;;  %v27_v14 = vld [vmem:[%s518_s0 + $0x68] sm:$0xff]  ;;  %v20_v15 = vld [vmem:[%s518_s0 + $0x30] sm:$0xff] }
   0x6   :  { %338 = vmatpush3.bf16.msra.mxu1 %v333_v3  ;;  %v28_v16 = vld [vmem:[%s518_s0 + $0x70] sm:$0xff]  ;;  %v21_v17 = vld [vmem:[%s518_s0 + $0x38] sm:$0xff]  ;;  %v227_v19 = vld [vmem:[%s519_s2 + $0x8] sm:$0xff] }
   0x7   :  { %v29_v18 = vld [vmem:[%s518_s0 + $0x78] sm:$0xff]  ;;  %v226_v20 = vld [vmem:[%s519_s2] sm:$0xff]  ;;  %v228_v30 = vld [vmem:[%s519_s2 + $0x10] sm:$0xff] }
   0x8   :  { %310 = vmatmul.mubr.msk.f32.vlgmr.msra.gmra.mrb[0].mxu0 %vm32_vm0, %v15_v5  ;;  %v229_v29 = vld [vmem:[%s519_s2 + $0x18] sm:$0xff]  ;;  %v231_v39 = vld [vmem:[%s519_s2 + $0x28] sm:$0xff]  ;;  %v230_v40 = vld [vmem:[%s519_s2 + $0x20] sm:$0xff] }
   0x9   :  { %322 = vmatmul.mubr.msk.f32.vlgmr.msra.gmra.mrb[0].mxu1 %vm32_vm0, %v23_v6  ;;  %312 = vmatprep.mubr.msk.f32.mxu0 %vm32_vm0, %v16_v7  ;;  %v233_v49 = vld [vmem:[%s519_s2 + $0x38] sm:$0xff]  ;;  %v232_v50 = vld [vmem:[%s519_s2 + $0x30] sm:$0xff] }
   0xa   :  { %324 = vmatprep.mubr.msk.f32.mxu1 %vm32_vm0, %v24_v8 }
   0xc   :  { %313 = vmatmul.mubr.msk.f32.gmra.mrb[2].mxu0 %vm32_vm0, %v17_v9 }
   0xd   :  { %325 = vmatmul.mubr.msk.f32.gmra.mrb[2].mxu1 %vm32_vm0, %v25_v10  ;;  %315 = vmatprep.mubr.msk.f32.mxu0 %vm32_vm0, %v18_v11 }
   0xe   :  { %327 = vmatprep.mubr.msk.f32.mxu1 %vm32_vm0, %v26_v12 }
  0x10   :  { %316 = vmatmul.mubr.msk.f32.gmra.mrb[4].mxu0 %vm32_vm0, %v19_v13 }
  0x11   :  { %328 = vmatmul.mubr.msk.f32.gmra.mrb[4].mxu1 %vm32_vm0, %v27_v14  ;;  %318 = vmatprep.mubr.msk.f32.mxu0 %vm32_vm0, %v20_v15 }
  0x12   :  { %330 = vmatprep.mubr.msk.f32.mxu1 %vm32_vm0, %v28_v16 }
  0x14   :  { %319 = vmatmul.mubr.msk.f32.gmra.mrb[6].mxu0 %vm32_vm0, %v21_v17 }
  0x15   :  { %331 = vmatmul.mubr.msk.f32.gmra.mrb[6].mxu1 %vm32_vm0, %v29_v18 }
  0xdb   :  { %v311_v21 = vpop.f32.mrb[0].mxu0 }
  0xdc   :  { %v323_v22 = vpop.f32.mrb[0].mxu1  ;;  %v235_v23 = vadd.f32 %v311_v21, %v227_v19  ;;  %v147_v25 = vpop.f32.mrb[1].mxu0 }
  0xdd   :  { %v243_v24 = vadd.f32 %v323_v22, %v227_v19  ;;  %v187_v26 = vpop.f32.mrb[1].mxu1  ;;  %v234_v27 = vadd.f32 %v226_v20, %v147_v25 }
  0xde   :  { %v242_v28 = vadd.f32 %v226_v20, %v187_v26  ;;  %252 = vst.msk [vmem:[%s520_s3 + $0x8] sm:$0xff] %vm250_vm1, %v235_v23 }
  0xdf   :  { %260 = vst.msk [vmem:[%s520_s3 + $0x48] sm:$0xff] %vm250_vm1, %v243_v24  ;;  %251 = vst.msk [vmem:[%s520_s3] sm:$0xff] %vm250_vm1, %v234_v27  ;;  %v314_v31 = vpop.f32.mrb[2].mxu0 }
  0xe0   :  { %259 = vst.msk [vmem:[%s520_s3 + $0x40] sm:$0xff] %vm250_vm1, %v242_v28  ;;  %v326_v32 = vpop.f32.mrb[2].mxu1  ;;  %v237_v33 = vadd.f32 %v314_v31, %v229_v29  ;;  %v157_v35 = vpop.f32.mrb[3].mxu0 }
  0xe1   :  { %v245_v34 = vadd.f32 %v326_v32, %v229_v29  ;;  %v197_v36 = vpop.f32.mrb[3].mxu1  ;;  %v236_v37 = vadd.f32 %v228_v30, %v157_v35 }
  0xe2   :  { %v244_v38 = vadd.f32 %v228_v30, %v197_v36  ;;  %254 = vst.msk [vmem:[%s520_s3 + $0x18] sm:$0xff] %vm250_vm1, %v237_v33 }
  0xe3   :  { %262 = vst.msk [vmem:[%s520_s3 + $0x58] sm:$0xff] %vm250_vm1, %v245_v34  ;;  %253 = vst.msk [vmem:[%s520_s3 + $0x10] sm:$0xff] %vm250_vm1, %v236_v37  ;;  %v317_v41 = vpop.f32.mrb[4].mxu0 }
  0xe4   :  { %261 = vst.msk [vmem:[%s520_s3 + $0x50] sm:$0xff] %vm250_vm1, %v244_v38  ;;  %v329_v42 = vpop.f32.mrb[4].mxu1  ;;  %v239_v43 = vadd.f32 %v317_v41, %v231_v39  ;;  %v167_v45 = vpop.f32.mrb[5].mxu0 }
  0xe5   :  { %v247_v44 = vadd.f32 %v329_v42, %v231_v39  ;;  %v207_v46 = vpop.f32.mrb[5].mxu1  ;;  %v238_v47 = vadd.f32 %v230_v40, %v167_v45 }
  0xe6   :  { %v246_v48 = vadd.f32 %v230_v40, %v207_v46  ;;  %256 = vst.msk [vmem:[%s520_s3 + $0x28] sm:$0xff] %vm250_vm1, %v239_v43 }
  0xe7   :  { %264 = vst.msk [vmem:[%s520_s3 + $0x68] sm:$0xff] %vm250_vm1, %v247_v44  ;;  %255 = vst.msk [vmem:[%s520_s3 + $0x20] sm:$0xff] %vm250_vm1, %v238_v47  ;;  %v320_v51 = vpop.f32.mrb[6].mxu0 }
  0xe8   :  { %263 = vst.msk [vmem:[%s520_s3 + $0x60] sm:$0xff] %vm250_vm1, %v246_v48  ;;  %v332_v52 = vpop.f32.mrb[6].mxu1  ;;  %v241_v53 = vadd.f32 %v320_v51, %v233_v49  ;;  %v177_v55 = vpop.f32.mrb[7].mxu0 }
  0xe9   :  { %v249_v54 = vadd.f32 %v332_v52, %v233_v49  ;;  %v217_v56 = vpop.f32.mrb[7].mxu1  ;;  %v240_v57 = vadd.f32 %v232_v50, %v177_v55 }
  0xea   :  { %v248_v58 = vadd.f32 %v232_v50, %v217_v56  ;;  %258 = vst.msk [vmem:[%s520_s3 + $0x38] sm:$0xff] %vm250_vm1, %v241_v53 }
  0xeb   :  { %266 = vst.msk [vmem:[%s520_s3 + $0x78] sm:$0xff] %vm250_vm1, %v249_v54  ;;  %257 = vst.msk [vmem:[%s520_s3 + $0x30] sm:$0xff] %vm250_vm1, %v240_v57 }
  0xec   :  { %265 = vst.msk [vmem:[%s520_s3 + $0x70] sm:$0xff] %vm250_vm1, %v248_v58 }

</bundles_post_ra>
